<compile_context>
chip_gen: v7x
topology: tpu7x:2x2x1
jax: 0.10.0
libtpu: 0.0.40
codegen_flags: <defaults>
</compile_context>

<pallas_src>
import jax
import jax.numpy as jnp
from jax.experimental import pallas as pl
from jax.experimental.pallas import tpu as pltpu


def _softmax_last(x, *, approx):
    """Numerically-stable softmax along the last (lane) axis, f32 math."""
    m = jnp.max(x, axis=-1, keepdims=True)
    e = jnp.exp(x - m)
    return e * pl.reciprocal(jnp.sum(e, axis=-1, keepdims=True), approx=approx)


def softmax_mlp_kernel(x_ref, w1_ref, w2_ref, w3_ref, b_ref, o_ref):
    # Static layer widths (trace-time Python ints).
    h1 = w1_ref.shape[1]          # 16
    h2 = w2_ref.shape[1]          # 16
    n_out = w3_ref.shape[1]       # n_output (unpadded)

    b = b_ref[...]                # (3, bw) f32 packed biases

    # x arrives as f32 (no extra HBM cast pass); cast to bf16 in-kernel for MXU.
    x = x_ref[...].astype(w1_ref.dtype)

    # layer 1: bf16 MXU matmul, f32 accumulate, f32 softmax (approx recip -> EUP)
    z1 = jnp.dot(x, w1_ref[...], preferred_element_type=jnp.float32)
    z1 = z1 + b[0:1, :h1]
    a1 = _softmax_last(z1, approx=True)

    # layer 2
    z2 = jnp.dot(a1.astype(w2_ref.dtype), w2_ref[...],
                 preferred_element_type=jnp.float32)
    z2 = z2 + b[1:2, :h2]
    a2 = _softmax_last(z2, approx=True)

    # layer 3: real lanes only (no padding); exact reciprocal keeps row sums = 1
    # to f32 precision.
    z3 = jnp.dot(a2.astype(w3_ref.dtype), w3_ref[...],
                 preferred_element_type=jnp.float32)
    z3 = z3 + b[2:3, :n_out]
    a3 = _softmax_last(z3, approx=False)

    o_ref[...] = a3.astype(o_ref.dtype)   # (TB, n_out) store, no padded lanes


def prepare_params(params, *, compute_dtype=jnp.bfloat16):
    """One-time prep: transpose torch (out,in) weights to (in,out), cast to
    bf16, and pack the three biases into a single (3, bw) f32 buffer (one tiny
    resident DMA instead of three)."""
    (w1, b1), (w2, b2), (w3, b3) = params["l1"], params["l2"], params["l3"]
    n_out = w3.shape[0]

    w1t = w1.T.astype(compute_dtype)                       # (n_in, 16)
    w2t = w2.T.astype(compute_dtype)                       # (16, 16)
    w3t = w3.T.astype(compute_dtype)                       # (16, n_out)

    bw = max(b1.shape[0], b2.shape[0], b3.shape[0])
    bpack = jnp.zeros((3, bw), jnp.float32)
    bpack = bpack.at[0, :b1.shape[0]].set(b1.astype(jnp.float32))
    bpack = bpack.at[1, :b2.shape[0]].set(b2.astype(jnp.float32))
    bpack = bpack.at[2, :b3.shape[0]].set(b3.astype(jnp.float32))

    return {"w1": w1t, "w2": w2t, "w3": w3t, "b": bpack,
            "n_output": n_out, "compute_dtype": compute_dtype}


def _xla_forward(x, prepped):
    """Fused plain-XLA path for tiny batches (launch overhead dominates there)."""
    w1, w2, w3, b = prepped["w1"], prepped["w2"], prepped["w3"], prepped["b"]
    h1, h2, n_out = w1.shape[1], w2.shape[1], w3.shape[1]
    a1 = jax.nn.softmax(x @ w1.astype(jnp.float32) + b[0, :h1], axis=-1)
    a2 = jax.nn.softmax(a1 @ w2.astype(jnp.float32) + b[1, :h2], axis=-1)
    return jax.nn.softmax(a2 @ w3.astype(jnp.float32) + b[2, :n_out], axis=-1)


def softmax_model_pallas(x, prepped, *, tile_batch=2048):
    """x: (B, n_input) f32. prepped: output of prepare_params()."""
    B, n_in = x.shape
    w1, w2, w3, b = prepped["w1"], prepped["w2"], prepped["w3"], prepped["b"]
    n_out = prepped["n_output"]

    # Batch tile: full batch if small, else a multiple of 8.  Prefer >= 2 grid
    # steps so v7x's two TensorCores both get work (no-op on 1-TC v5e/v6e).
    TB = min(tile_batch, B)
    if pl.cdiv(B, TB) < 2 and B >= 16:
        TB = (((B + 1) // 2) + 7) // 8 * 8
    grid = (pl.cdiv(B, TB),)
    # NOTE: when B % TB != 0, the padded rows of the last grid step compute
    # garbage softmaxes; this is fine only because Pallas masks OOB output
    # writeback (would need explicit masking if refactored to manual DMA).

    resident = lambda shape: pl.BlockSpec(shape, lambda i: (0,) * len(shape))

    out = pl.pallas_call(
        softmax_mlp_kernel,
        out_shape=jax.ShapeDtypeStruct((B, n_out), jnp.float32),
        grid=grid,
        in_specs=[
            pl.BlockSpec((TB, n_in), lambda i: (i, 0)),   # batch-tiled x (f32)
            resident(w1.shape),                            # VMEM-resident weights
            resident(w2.shape),
            resident(w3.shape),
            resident(b.shape),                             # packed biases
        ],
        out_specs=pl.BlockSpec((TB, n_out), lambda i: (i, 0)),
        compiler_params=pltpu.CompilerParams(
            dimension_semantics=("parallel",),             # megacore on v7x
        ),
    )(x, w1, w2, w3, b)

    return out


def softmax_model(x, prepped, *, tile_batch=2048, min_pallas_rows=1024):
    """Dispatch: fused XLA for tiny batches, Pallas kernel otherwise."""
    if x.shape[0] < min_pallas_rows:
        return _xla_forward(x, prepped)
    return softmax_model_pallas(x, prepped, tile_batch=tile_batch)


def init_params(key, n_input, n_output, hidden=16):
    """Deterministic init matching nn.Linear's default U(-1/sqrt(fan_in), +)."""
    def linear(k, fan_in, fan_out):
        kw, kb = jax.random.split(k)
        bound = 1.0 / jnp.sqrt(fan_in)
        w = jax.random.uniform(kw, (fan_out, fan_in), jnp.float32, -bound, bound)
        b = jax.random.uniform(kb, (fan_out,), jnp.float32, -bound, bound)
        return w, b

    k1, k2, k3 = jax.random.split(key, 3)
    return {
        "l1": linear(k1, n_input, hidden),
        "l2": linear(k2, hidden, hidden),
        "l3": linear(k3, hidden, n_output),
    }


def reference(x, params):
    """Plain-JAX f32 reference of the PyTorch forward (softmax over dim=1)."""
    h = x
    for name in ("l1", "l2", "l3"):
        w, b = params[name]
        h = h @ w.T + b
        h = jax.nn.softmax(h, axis=1)
    return h


if __name__ == "__main__":
    key = jax.random.PRNGKey(0)
    kx, kp, kx2 = jax.random.split(key, 3)

    # Small demo shape consistent with the module.
    B, n_input, n_output = 8, 32, 8
    x = jax.random.normal(kx, (B, n_input), jnp.float32)
    params = init_params(kp, n_input, n_output)
    prepped = prepare_params(params)

    # Force the Pallas path even at tiny B so the kernel itself is exercised.
    out = jax.block_until_ready(softmax_model_pallas(x, prepped))
    ref = reference(x, params)
    assert out.shape == (B, n_output)
    # bf16 matmul operands + approx reciprocal (first two softmaxes) give
    # ~1e-3-level error vs the f32 reference.
    assert jnp.allclose(out, ref, atol=3e-3, rtol=3e-3), "mismatch vs reference"
    # Final softmax uses exact reciprocal in f32 -> rows sum tightly to 1.
    assert jnp.allclose(jnp.sum(out, axis=-1), 1.0, atol=1e-5)

    # Exercise the multi-step batch grid / software pipeline (4 tiles of 256),
    # via the dispatching wrapper (B >= min_pallas_rows -> Pallas path).
    B2 = 1024
    x2 = jax.random.normal(kx2, (B2, n_input), jnp.float32)
    out2 = jax.block_until_ready(softmax_model(x2, prepped, tile_batch=256))
    ref2 = reference(x2, params)
    assert out2.shape == (B2, n_output)
    assert jnp.allclose(out2, ref2, atol=3e-3, rtol=3e-3), "mismatch (tiled run)"
    assert jnp.allclose(jnp.sum(out2, axis=-1), 1.0, atol=1e-5)

    print("KERNEL_OK")
</pallas_src>

<mosaic_0001>
module attributes {stable_mosaic.version = 11 : i64} {
  func.func @softmax_mlp_kernel(%arg0: i32, %arg1: memref<8x32xf32, #tpu.memory_space<vmem>>, %arg2: memref<32x16xbf16, #tpu.memory_space<vmem>>, %arg3: memref<16x16xbf16, #tpu.memory_space<vmem>>, %arg4: memref<16x8xbf16, #tpu.memory_space<vmem>>, %arg5: memref<3x16xf32, #tpu.memory_space<vmem>>, %arg6: memref<8x8xf32, #tpu.memory_space<vmem>>) attributes {dimension_semantics = [#tpu.dimension_semantics<parallel>], iteration_bounds = array<i64: 1>, scalar_prefetch = 0 : i64, scratch_operands = 0 : i64, tpu.core_type = #tpu.core_type<tc>, window_params = [{transform_indices = @transform_0, window_bounds = array<i64: 8, 32>}, {pipeline_mode = #tpu.pipeline_mode<synchronous>, transform_indices = @transform_1, window_bounds = array<i64: 32, 16>}, {pipeline_mode = #tpu.pipeline_mode<synchronous>, transform_indices = @transform_2, window_bounds = array<i64: 16, 16>}, {pipeline_mode = #tpu.pipeline_mode<synchronous>, transform_indices = @transform_3, window_bounds = array<i64: 16, 8>}, {pipeline_mode = #tpu.pipeline_mode<synchronous>, transform_indices = @transform_4, window_bounds = array<i64: 3, 16>}, {transform_indices = @transform_5, window_bounds = array<i64: 8, 8>}]} {
    %c0 = arith.constant 0 : index
    %c0_0 = arith.constant 0 : index
    %0 = vector.load %arg5[%c0, %c0_0] : memref<3x16xf32, #tpu.memory_space<vmem>>, vector<3x16xf32>
    %c0_1 = arith.constant 0 : index
    %c0_2 = arith.constant 0 : index
    %1 = vector.load %arg1[%c0_1, %c0_2] : memref<8x32xf32, #tpu.memory_space<vmem>>, vector<8x32xf32>
    %2 = arith.truncf %1 : vector<8x32xf32> to vector<8x32xbf16>
    %c0_3 = arith.constant 0 : index
    %c0_4 = arith.constant 0 : index
    %3 = vector.load %arg2[%c0_3, %c0_4] : memref<32x16xbf16, #tpu.memory_space<vmem>>, vector<32x16xbf16>
    %cst = arith.constant dense<0.000000e+00> : vector<8x16xf32>
    %4 = tpu.matmul %2, %3, %cst {dimension_numbers = #tpu.dot_dimension_numbers<[1], [0], [0], [1], [0, 0, 1, 1], [], []>} : vector<8x32xbf16>, vector<32x16xbf16>, vector<8x16xf32> -> vector<8x16xf32>
    %5 = vector.extract_strided_slice %0 {offsets = [0, 0], sizes = [1, 16], strides = [1, 1]} : vector<3x16xf32> to vector<1x16xf32>
    %6 = vector.broadcast %5 : vector<1x16xf32> to vector<8x16xf32>
    %7 = arith.addf %4, %6 : vector<8x16xf32>
    %cst_5 = arith.constant dense<0xFF800000> : vector<8xf32>
    %8 = vector.multi_reduction <maximumf>, %7, %cst_5 [1] : vector<8x16xf32> to vector<8xf32>
    %9 = vector.shape_cast %8 : vector<8xf32> to vector<8x1xf32>
    %10 = vector.broadcast %9 : vector<8x1xf32> to vector<8x16xf32>
    %11 = arith.subf %7, %10 : vector<8x16xf32>
    %12 = math.exp %11 : vector<8x16xf32>
    %cst_6 = arith.constant dense<0.000000e+00> : vector<8xf32>
    %13 = vector.multi_reduction <add>, %12, %cst_6 [1] : vector<8x16xf32> to vector<8xf32>
    %14 = vector.shape_cast %13 : vector<8xf32> to vector<8x1xf32>
    %15 = tpu.reciprocal %14 {approx = true} : vector<8x1xf32> -> vector<8x1xf32>
    %16 = vector.broadcast %15 : vector<8x1xf32> to vector<8x16xf32>
    %17 = arith.mulf %12, %16 : vector<8x16xf32>
    %18 = arith.truncf %17 : vector<8x16xf32> to vector<8x16xbf16>
    %c0_7 = arith.constant 0 : index
    %c0_8 = arith.constant 0 : index
    %19 = vector.load %arg3[%c0_7, %c0_8] : memref<16x16xbf16, #tpu.memory_space<vmem>>, vector<16x16xbf16>
    %cst_9 = arith.constant dense<0.000000e+00> : vector<8x16xf32>
    %20 = tpu.matmul %18, %19, %cst_9 {dimension_numbers = #tpu.dot_dimension_numbers<[1], [0], [0], [1], [0, 0, 1, 1], [], []>} : vector<8x16xbf16>, vector<16x16xbf16>, vector<8x16xf32> -> vector<8x16xf32>
    %21 = vector.extract_strided_slice %0 {offsets = [1, 0], sizes = [1, 16], strides = [1, 1]} : vector<3x16xf32> to vector<1x16xf32>
    %22 = vector.broadcast %21 : vector<1x16xf32> to vector<8x16xf32>
    %23 = arith.addf %20, %22 : vector<8x16xf32>
    %cst_10 = arith.constant dense<0xFF800000> : vector<8xf32>
    %24 = vector.multi_reduction <maximumf>, %23, %cst_10 [1] : vector<8x16xf32> to vector<8xf32>
    %25 = vector.shape_cast %24 : vector<8xf32> to vector<8x1xf32>
    %26 = vector.broadcast %25 : vector<8x1xf32> to vector<8x16xf32>
    %27 = arith.subf %23, %26 : vector<8x16xf32>
    %28 = math.exp %27 : vector<8x16xf32>
    %cst_11 = arith.constant dense<0.000000e+00> : vector<8xf32>
    %29 = vector.multi_reduction <add>, %28, %cst_11 [1] : vector<8x16xf32> to vector<8xf32>
    %30 = vector.shape_cast %29 : vector<8xf32> to vector<8x1xf32>
    %31 = tpu.reciprocal %30 {approx = true} : vector<8x1xf32> -> vector<8x1xf32>
    %32 = vector.broadcast %31 : vector<8x1xf32> to vector<8x16xf32>
    %33 = arith.mulf %28, %32 : vector<8x16xf32>
    %34 = arith.truncf %33 : vector<8x16xf32> to vector<8x16xbf16>
    %c0_12 = arith.constant 0 : index
    %c0_13 = arith.constant 0 : index
    %35 = vector.load %arg4[%c0_12, %c0_13] : memref<16x8xbf16, #tpu.memory_space<vmem>>, vector<16x8xbf16>
    %cst_14 = arith.constant dense<0.000000e+00> : vector<8x8xf32>
    %36 = tpu.matmul %34, %35, %cst_14 {dimension_numbers = #tpu.dot_dimension_numbers<[1], [0], [0], [1], [0, 0, 1, 1], [], []>} : vector<8x16xbf16>, vector<16x8xbf16>, vector<8x8xf32> -> vector<8x8xf32>
    %37 = vector.extract_strided_slice %0 {offsets = [2, 0], sizes = [1, 8], strides = [1, 1]} : vector<3x16xf32> to vector<1x8xf32>
    %38 = vector.broadcast %37 : vector<1x8xf32> to vector<8x8xf32>
    %39 = arith.addf %36, %38 : vector<8x8xf32>
    %cst_15 = arith.constant dense<0xFF800000> : vector<8xf32>
    %40 = vector.multi_reduction <maximumf>, %39, %cst_15 [1] : vector<8x8xf32> to vector<8xf32>
    %41 = vector.shape_cast %40 : vector<8xf32> to vector<8x1xf32>
    %42 = vector.broadcast %41 : vector<8x1xf32> to vector<8x8xf32>
    %43 = arith.subf %39, %42 : vector<8x8xf32>
    %44 = math.exp %43 : vector<8x8xf32>
    %cst_16 = arith.constant dense<0.000000e+00> : vector<8xf32>
    %45 = vector.multi_reduction <add>, %44, %cst_16 [1] : vector<8x8xf32> to vector<8xf32>
    %46 = vector.shape_cast %45 : vector<8xf32> to vector<8x1xf32>
    %47 = tpu.reciprocal %46 : vector<8x1xf32> -> vector<8x1xf32>
    %48 = vector.broadcast %47 : vector<8x1xf32> to vector<8x8xf32>
    %49 = arith.mulf %44, %48 : vector<8x8xf32>
    %c0_17 = arith.constant 0 : index
    %c0_18 = arith.constant 0 : index
    %50 = vector.load %arg6[%c0_17, %c0_18] : memref<8x8xf32, #tpu.memory_space<vmem>>, vector<8x8xf32>
    tpu.vector_store %arg6[%c0_17, %c0_18], %49 {strides = array<i32>} : memref<8x8xf32, #tpu.memory_space<vmem>>, vector<8x8xf32>,
    return
  }
  func.func @transform_0(%arg0: i32) -> (i32, i32) {
    %c0_i32 = arith.constant 0 : i32
    %c0_i32_0 = arith.constant 0 : i32
    return %arg0, %c0_i32 : i32, i32
  }
  func.func @transform_1(%arg0: i32) -> (i32, i32) {
    %c0_i32 = arith.constant 0 : i32
    %c0_i32_0 = arith.constant 0 : i32
    %c0_i32_1 = arith.constant 0 : i32
    return %c0_i32, %c0_i32_0 : i32, i32
  }
  func.func @transform_2(%arg0: i32) -> (i32, i32) {
    %c0_i32 = arith.constant 0 : i32
    %c0_i32_0 = arith.constant 0 : i32
    %c0_i32_1 = arith.constant 0 : i32
    return %c0_i32, %c0_i32_0 : i32, i32
  }
  func.func @transform_3(%arg0: i32) -> (i32, i32) {
    %c0_i32 = arith.constant 0 : i32
    %c0_i32_0 = arith.constant 0 : i32
    %c0_i32_1 = arith.constant 0 : i32
    return %c0_i32, %c0_i32_0 : i32, i32
  }
  func.func @transform_4(%arg0: i32) -> (i32, i32) {
    %c0_i32 = arith.constant 0 : i32
    %c0_i32_0 = arith.constant 0 : i32
    %c0_i32_1 = arith.constant 0 : i32
    return %c0_i32, %c0_i32_0 : i32, i32
  }
  func.func @transform_5(%arg0: i32) -> (i32, i32) {
    %c0_i32 = arith.constant 0 : i32
    %c0_i32_0 = arith.constant 0 : i32
    return %arg0, %c0_i32 : i32, i32
  }
}

</mosaic_0001>

<bundles_post_ra>
// kernel: tpu_custom_call.1
= control target key start
LH: loop header
LB: loop body
LE: loop exit
PB: predicated region body
PF: predicated region fallthrough
CT: control target
= control target key end

     0   :  { %v328_v1 = vmov 0.0   ;;  %vm329_vm0 = vmmov 0   ;;  %s403_s0 = inlined_call_operand.vmem [shape: f32[8,32], index: 0, kind: input, shape index: {}]   ;;  %s404_s1 = inlined_call_operand.vmem [shape: bf16[32,16], index: 1, kind: input, shape index: {}]   ;;  %s405_s2 = inlined_call_operand.vmem [shape: bf16[16,16], index: 2, kind: input, shape index: {}]   ;;  %s406_s3 = inlined_call_operand.vmem [shape: bf16[16,8], index: 3, kind: input, shape index: {}]   ;;  %s407_s4 = inlined_call_operand.vmem [shape: f32[3,16], index: 4, kind: input, shape index: {}]   ;;  %s408_s5 = inlined_call_operand.hbm [shape: f32[8,8], index: 5, kind: output, shape index: {}]  }
   0x1   :  { %v288_v0 = vld [vmem:[%s404_s1] sm:$0xff]   ;;  %265 = vmatprep.subr.bf16.mxu0 %v328_v1  ;;  %273 = vmatprep.subr.bf16.mxu1 %v328_v1  ;;  %v289_v2 = vld [vmem:[%s404_s1 + $0x8] sm:$0xff]  }
   0x2   :  { %266 = vmatpush3.bf16.msra.mxu0 %v288_v0  ;;  %269 = vmatprep.mubr.msk.bf16.mxu0 %vm329_vm0, %v328_v1  ;;  %v23_v3 = vld [vmem:[%s403_s0] sm:$0xff] }
   0x3   :  { %267 = vmatprep.subr.bf16.mxu0 %v328_v1  ;;  %275 = vmatprep.mubr.msk.bf16.mxu1 %vm329_vm0, %v328_v1 }
   0x4   :  { %10 = vsyncpa [#allocation3], 0  ;;  %v24_v4 = vpack.c.bf16 %v23_v3, %v23_v3  ;;  %vm45_vm1 = vcmask 261120   ;;  %v29_v5 = vlaneseq  ;;  %v22_v8 = vld [vmem:[%s407_s4] sm:$0x7]  ;;  %vm89_vm2 = vcmask 130048  }
   0x5   :  { %v290_v21 = vld [vmem:[%s405_s2] sm:$0xff]   ;;  %vm224_vm3 = vcmask 64512  }
   0x6   :  { %268 = vmatpush3.bf16.msra.mxu0 %v289_v2  ;;  %v30_v6 = vshrl.u32 %v29_v5, 7  ;;  %274 = vmatpush3.bf16.msra.mxu1 %v290_v21  ;;  %v291_v39 = vld [vmem:[%s406_s3] sm:$0xff]   ;;  %s330_s3 = smov [#allocation2]  }
   0x7   :  { %279 = vmatprep.subr.bf16.mxu1 %v328_v1  ;;  %s243_s26 = sshll.u32 %s330_s3, 4  ;;  %s244_s26 = int_to_ptr.vmem [resolvable:$true] %s243_s26 }
   0x8   :  { %v31_v7 = vsub.s32 0, %v30_v6  ;;  %v106_v26 = vsub.s32 1, %v30_v6  ;;  %v173_v44 = vsub.s32 2, %v30_v6  ;;  %s304_s27 = scalar_lea.vmem %s244_s26, 128  ;;  %p309_p1 = scmp.lt.s32.totalorder %s244_s26, %s244_s26 }
   0x9   :  { %270 = vmatmul.mubr.msk.bf16.vlgmr.msra.gmra.mrb[0].mxu0 %vm45_vm1, %v24_v4  ;;  %p305_p0 = scmp.ne.s32.totalorder %s244_s26, %s304_s27  ;;  %p310_p2 = scmp.lt.s32.totalorder %s304_s27, %s304_s27 }
   0xa   :  { %v32_v9 = vrot.slane %v22_v8, %v31_v7  ;;  %v107_v27 = vrot.slane %v22_v8, %v106_v26  ;;  %v174_v45 = vrot.slane %v22_v8, %v173_v44 }
   0xb   :  { %p311_p3 = por %p310_p2, %p309_p1 }
   0xd   :  { %p312_p4 = pnand %p311_p3, %p305_p0 }
  0xdc   :  { %v83_v10 = vpop.f32.mrb[0].mxu0 }
  0xdd   :  { %v84_v11 = vadd.f32 %v83_v10, %v32_v9  ;;  %v271_v12 = vpop.f32.mrb[1].mxu0 }
  0xde   :  { %v86_v13 = vpop.f32.mrb[2].mxu0 }
  0xdf   :  { %v272_v14 = vpop.f32.mrb[3].mxu0  ;;  %v90_v15 = vsel %vm89_vm2, %v84_v11, -inf }
  0xe0   :  { %91 = vmax.xlane.f32.xlu0 %v90_v15 }
 0x16d   :  { %v92_v16 = vpop.xlane.xlu0 %91 }
 0x16e   :  { %v93_v17 = vsub.f32 %v84_v11, %v92_v16 }
 0x170   :  { %v94_v18 = vmul.f32 1.442695, %v93_v17 }
 0x172   :  { %292 = vpow2.f32 %v94_v18 }
 0x17c   :  { %v293_v19 = vpop.eup %292 }
 0x17d   :  { %v96_v20 = vsel %vm89_vm2, %v293_v19, 0.0 }
 0x17e   :  { %97 = vadd.xlane.f32.xlu0 %v96_v20 }
 0x20b   :  { %v98_v22 = vpop.xlane.xlu0 %97 }
 0x20c   :  { %294 = vrcp.f32 %v98_v22 }
 0x216   :  { %v295_v23 = vpop.eup %294 }
 0x217   :  { %v100_v24 = vmul.f32 %v295_v23, %v293_v19 }
 0x219   :  { %v101_v25 = vpack.c.bf16 %v100_v24, %v100_v24 }
 0x21b   :  { %276 = vmatmul.mubr.msk.bf16.vlgmr.msra.gmra.mrb[0].mxu1 %vm89_vm2, %v101_v25 }
 0x21c   :  { %281 = vmatprep.mubr.msk.bf16.mxu1 %vm329_vm0, %v328_v1  ;;  %280 = vmatpush3.bf16.msra.mxu1 %v291_v39 }
 0x2ee   :  { %v151_v28 = vpop.f32.mrb[0].mxu1 }
 0x2ef   :  { %v152_v29 = vadd.f32 %v151_v28, %v107_v27  ;;  %v277_v30 = vpop.f32.mrb[1].mxu1 }
 0x2f0   :  { %v154_v31 = vpop.f32.mrb[2].mxu1 }
 0x2f1   :  { %v278_v32 = vpop.f32.mrb[3].mxu1  ;;  %v157_v33 = vsel %vm89_vm2, %v152_v29, -inf }
 0x2f2   :  { %158 = vmax.xlane.f32.xlu1 %v157_v33 }
 0x37f   :  { %v159_v34 = vpop.xlane.xlu1 %158 }
 0x380   :  { %v160_v35 = vsub.f32 %v152_v29, %v159_v34 }
 0x382   :  { %v161_v36 = vmul.f32 1.442695, %v160_v35 }
 0x384   :  { %296 = vpow2.f32 %v161_v36 }
 0x38e   :  { %v297_v37 = vpop.eup %296 }
 0x38f   :  { %v163_v38 = vsel %vm89_vm2, %v297_v37, 0.0 }
 0x390   :  { %164 = vadd.xlane.f32.xlu1 %v163_v38 }
 0x41d   :  { %v165_v40 = vpop.xlane.xlu1 %164 }
 0x41e   :  { %298 = vrcp.f32 %v165_v40 }
 0x428   :  { %v299_v41 = vpop.eup %298 }
 0x429   :  { %v167_v42 = vmul.f32 %v299_v41, %v297_v37 }
 0x42b   :  { %v168_v43 = vpack.c.bf16 %v167_v42, %v167_v42 }
 0x42d   :  { %282 = vmatmul.mubr.msk.bf16.vlgmr.msra.gmra.mrb[4].mxu1 %vm89_vm2, %v168_v43 }
 0x500   :  { %v218_v46 = vpop.f32.mrb[4].mxu1 }
 0x501   :  { %v219_v47 = vadd.f32 %v218_v46, %v174_v45  ;;  %v283_v48 = vpop.f32.mrb[5].mxu1 }
 0x502   :  { %v221_v49 = vpop.f32.mrb[6].mxu1 }
 0x503   :  { %v284_v50 = vpop.f32.mrb[7].mxu1  ;;  %v225_v51 = vsel %vm224_vm3, %v219_v47, -inf }
 0x504   :  { %226 = vmax.xlane.f32.xlu0 %v225_v51 }
 0x591   :  { %v227_v52 = vpop.xlane.xlu0 %226 }
 0x592   :  { %v228_v53 = vsub.f32 %v219_v47, %v227_v52 }
 0x594   :  { %v229_v54 = vmul.f32 1.442695, %v228_v53 }
 0x596   :  { %300 = vpow2.f32 %v229_v54 }
 0x5a0   :  { %v301_v55 = vpop.eup %300 }
 0x5a1   :  { %v231_v56 = vsel %vm224_vm3, %v301_v55, 0.0 }
 0x5a2   :  { %232 = vadd.xlane.f32.xlu1 %v231_v56 }
 0x62f   :  { %v233_v57 = vpop.xlane.xlu1 %232 }
 0x630   :  { %302 = vrcp.f32 %v233_v57 }
 0x63a   :  { %v303_v58 = vpop.eup %302 }
 0x63b   :  { %v235_v59 = vmul.f32 %v303_v58, %v301_v55 }
 0x63d   :  { %236 = vst.msk [vmem:[#allocation2] sm:$0xff] %vm224_vm3, %v235_v59 }
 0x63e   :  { %315 = shalt.err (!%p312_p4)
}
 0x63f   :  { %s316_s30 = scalar_lea.hbm %s408_s5, 128 }
 0x640   :  { %p317_p5 = scmp.ne.s32.totalorder %s408_s5, %s316_s30  ;;  %p320_p6 = scmp.lt.u32.totalorder %s316_s30, %s408_s5 }
 0x642   :  { %p322_p7 = pnand %p320_p6, %p317_p5 }
 0x644   :  { %325 = shalt.err (!%p322_p7)
}
 0x645   :  { %246 = dma.vmem_to_hbm [thread:$0]  %s244_s26, 128, %s408_s5, [#allocation3]  }
 0x646   :  { %326 = dma.done.wait [#allocation3], 128  }
 0x647   :  { %327 = vsyncadd [#allocation3], 4294967168 }
 0x648   :  { %250 = vsyncpa [#allocation3], 1 }

</bundles_post_ra>
